<compile_context>
chip_gen: v7x
topology: tpu7x:2x2x1
jax: 0.10.0
libtpu: 0.0.40
codegen_flags: <defaults>
</compile_context>

<pallas_src>
import jax
import jax.numpy as jnp
from jax.experimental import pallas as pl
from jax.experimental.pallas import tpu as pltpu


def _round_up(n, m):
    return ((n + m - 1) // m) * m


def _leaky_relu(x, slope=0.2):
    # Matches nn.LeakyReLU(0.2) in the reference module.
    return jnp.where(x > 0, x, slope * x)


def _pick_block_rows(B):
    """Largest batch tile that fits comfortably; prefer exact divisors of B.

    The model is tiny (weights stay VMEM-resident), so the tile only has to
    cover per-row I/O + intermediates (~3 KB/row): 512-2048 row tiles are safe
    on every generation including v7x (64 MiB VMEM).  We prefer a tile that
    divides B exactly (no batch padding / output slicing) and, when the batch
    allows, >=2 grid steps so v7x megacore can split the batch across its two
    TensorCores.
    """
    if B <= 1024:
        half = B // 2
        if B % 2 == 0 and half >= 128 and half % 8 == 0:
            return half           # 2 grid steps (v7x megacore), no padding
        return B                  # single tile: block == full dim, always legal
    for tb in (2048, 1024, 512, 256, 128):
        if B % tb == 0:
            return tb
    return 1024                   # ragged large batch: pad B up to a multiple


def autoencoder_kernel(x_ref,
                       w1_ref, b1_ref, w2_ref, b2_ref, w3_ref, b3_ref,
                       w4_ref, b4_ref, w5_ref, b5_ref, w6_ref, b6_ref,
                       enc_ref, dec_ref):
    bf16 = jnp.bfloat16
    latent_dim = enc_ref.shape[-1]      # real (unpadded) widths from the refs
    input_dim = dec_ref.shape[-1]

    # x arrives at its real feature width in f32; cast to bf16 here so the
    # wrapper never does an extra HBM pass over x.
    x = x_ref[...].astype(bf16)                          # [tb, input_dim]

    # ---------------- encoder ----------------
    h = jnp.dot(x, w1_ref[...], preferred_element_type=jnp.float32) + b1_ref[...]
    h = _leaky_relu(h).astype(bf16)
    # TODO(synk): nn.Dropout(p) — identity here (eval mode); training parity
    # would need a pltpu.prng_seed / prng_random_bits mask.
    h = jnp.dot(h, w2_ref[...], preferred_element_type=jnp.float32) + b2_ref[...]
    h = jnp.tanh(h).astype(bf16)
    enc = jnp.dot(h, w3_ref[...], preferred_element_type=jnp.float32) + b3_ref[...]
    enc_ref[...] = enc[:, :latent_dim].astype(enc_ref.dtype)   # real-width store

    # ---------------- decoder ----------------
    # Padded latent lanes of `enc` are exactly zero (zero-padded weights and
    # biases) and w4's padded rows are zero, so this is exact.
    d = jnp.dot(enc.astype(bf16), w4_ref[...],
                preferred_element_type=jnp.float32) + b4_ref[...]
    d = _leaky_relu(d).astype(bf16)
    d = jnp.dot(d, w5_ref[...], preferred_element_type=jnp.float32) + b5_ref[...]
    # TODO(synk): second nn.Dropout(p) — identity here (eval mode).
    dec = jnp.dot(d.astype(bf16), w6_ref[...],
                  preferred_element_type=jnp.float32) + b6_ref[...]
    dec_ref[...] = dec[:, :input_dim].astype(dec_ref.dtype)    # real-width store


def prepare_params(params):
    """One-time pad + cast of the natural-layout parameters for the kernel.

    Weights are [in_features, out_features].  Every hidden/latent/output
    feature dim is zero-padded to a multiple of 128 lanes (exact: padded lanes
    stay zero through LeakyReLU/Tanh and are sliced off in-kernel before the
    stores).  w1 keeps its real input width so `x` never needs padding.
    Call ONCE at init; the per-call forward just takes the prepared dict.
    """
    input_dim, h1 = params["w1"].shape
    h2 = params["w2"].shape[1]
    latent_dim = params["w3"].shape[1]
    h1p, h2p, latp, inp = (_round_up(d, 128) for d in (h1, h2, latent_dim, input_dim))

    layer_pads = [                            # (K_real, N_real, K_pad, N_pad)
        (input_dim, h1, input_dim, h1p),      # enc L1 (K stays at real x width)
        (h1, h2, h1p, h2p),                   # enc L2
        (h2, latent_dim, h2p, latp),          # enc L3
        (latent_dim, h2, latp, h2p),          # dec L1
        (h2, h1, h2p, h1p),                   # dec L2
        (h1, input_dim, h1p, inp),            # dec L3
    ]
    flat = []
    for idx, (kr, nr, kp, npd) in enumerate(layer_pads, start=1):
        w = jnp.pad(params[f"w{idx}"].astype(jnp.bfloat16),
                    ((0, kp - kr), (0, npd - nr)))
        b = jnp.pad(params[f"b{idx}"].astype(jnp.float32).reshape(1, -1),
                    ((0, 0), (0, npd - nr)))
        flat += [w, b]
    return {"flat": tuple(flat), "input_dim": input_dim, "latent_dim": latent_dim}


def autoencoder_forward(x, prepared, *, block_rows=None):
    """x: [B, input_dim] f32. Returns (encoded [B, latent], decoded [B, input])."""
    flat = prepared["flat"]
    input_dim = prepared["input_dim"]
    latent_dim = prepared["latent_dim"]
    B, xd = x.shape
    assert xd == input_dim, (xd, input_dim)

    tb = _pick_block_rows(B) if block_rows is None else block_rows
    B_pad = _round_up(B, tb)
    grid = (B_pad // tb,)

    # Batch padding only in the ragged case; feature dims are never padded in HBM.
    xb = x if B_pad == B else jnp.pad(x, ((0, B_pad - B), (0, 0)))

    in_specs = ([pl.BlockSpec((tb, input_dim), lambda i: (i, 0))] +
                [pl.BlockSpec(a.shape, lambda i: (0, 0)) for a in flat])
    out_specs = [pl.BlockSpec((tb, latent_dim), lambda i: (i, 0)),
                 pl.BlockSpec((tb, input_dim), lambda i: (i, 0))]
    out_shapes = (jax.ShapeDtypeStruct((B_pad, latent_dim), jnp.float32),
                  jax.ShapeDtypeStruct((B_pad, input_dim), jnp.float32))

    # Tight VMEM budget: double-buffered resident weights + I/O tiles plus
    # headroom for the six 128-lane f32 intermediates; ~2x estimate, no 32 MiB
    # floor, capped at 64 MiB so the same choice is safe on v7x.
    weight_bytes = sum(int(a.size) * a.dtype.itemsize for a in flat)
    io_bytes = tb * (2 * input_dim + latent_dim) * 4
    inter_bytes = 6 * tb * 128 * 4
    est = 2 * (weight_bytes + io_bytes) + inter_bytes
    vmem_limit = int(min(64 * 1024 * 1024, max(4 * 1024 * 1024, 2 * est)))

    fn = pl.pallas_call(
        autoencoder_kernel,
        out_shape=out_shapes,
        grid_spec=pltpu.PrefetchScalarGridSpec(
            num_scalar_prefetch=0,
            grid=grid,
            in_specs=in_specs,
            out_specs=out_specs,
        ),
        compiler_params=pltpu.CompilerParams(
            dimension_semantics=("parallel",),
            vmem_limit_bytes=vmem_limit),
    )
    enc, dec = fn(xb, *flat)
    if B_pad != B:
        enc, dec = enc[:B], dec[:B]
    return enc, dec


def init_params(key, input_dim, latent_dim, dtype=jnp.float32):
    """Deterministic synthetic parameter init (uniform, scaled by fan-in)."""
    dims = [
        (input_dim, latent_dim * 4),       # enc L1
        (latent_dim * 4, latent_dim * 2),  # enc L2
        (latent_dim * 2, latent_dim),      # enc L3
        (latent_dim, latent_dim * 2),      # dec L1
        (latent_dim * 2, latent_dim * 4),  # dec L2
        (latent_dim * 4, input_dim),       # dec L3
    ]
    params = {}
    for idx, (fan_in, fan_out) in enumerate(dims, start=1):
        key, kw, kb = jax.random.split(key, 3)
        bound = 1.0 / jnp.sqrt(jnp.float32(fan_in))
        params[f"w{idx}"] = jax.random.uniform(
            kw, (fan_in, fan_out), dtype, minval=-bound, maxval=bound)
        params[f"b{idx}"] = jax.random.uniform(
            kb, (1, fan_out), dtype, minval=-bound, maxval=bound)
    return params


def reference_forward(x, params):
    """Pure-JAX reference mimicking the kernel numerics (bf16 weights/acts,
    f32 accumulation, dropout = identity)."""
    bf = jnp.bfloat16

    def lin(a, w, b):
        return jnp.dot(a.astype(bf), w.astype(bf),
                       preferred_element_type=jnp.float32) + b

    h = lin(x, params["w1"], params["b1"])
    h = jnp.where(h > 0, h, 0.2 * h).astype(bf)
    h = jnp.tanh(lin(h, params["w2"], params["b2"])).astype(bf)
    enc = lin(h, params["w3"], params["b3"])
    d = lin(enc, params["w4"], params["b4"])
    d = jnp.where(d > 0, d, 0.2 * d).astype(bf)
    d = lin(d, params["w5"], params["b5"])
    dec = lin(d, params["w6"], params["b6"])
    return enc, dec


if __name__ == "__main__":
    key = jax.random.PRNGKey(0)
    batch, input_dim, latent_dim = 256, 32, 8   # -> 2 batch tiles of 128 rows

    kx, kp = jax.random.split(key)
    x = jax.random.normal(kx, (batch, input_dim), jnp.float32)
    params = init_params(kp, input_dim, latent_dim)
    prepared = prepare_params(params)           # one-time pad/cast (hoisted out of forward)

    enc, dec = autoencoder_forward(x, prepared)
    enc, dec = jax.block_until_ready((enc, dec))

    enc_ref, dec_ref = reference_forward(x, params)
    assert enc.shape == (batch, latent_dim)
    assert dec.shape == (batch, input_dim)
    assert jnp.allclose(enc, enc_ref, atol=1e-2, rtol=1e-2)
    assert jnp.allclose(dec, dec_ref, atol=1e-2, rtol=1e-2)

    print("KERNEL_OK")
</pallas_src>

<mosaic_0001>
module attributes {stable_mosaic.version = 11 : i64} {
  func.func @autoencoder_kernel(%arg0: i32, %arg1: memref<128x32xf32, #tpu.memory_space<vmem>>, %arg2: memref<32x128xbf16, #tpu.memory_space<vmem>>, %arg3: memref<1x128xf32, #tpu.memory_space<vmem>>, %arg4: memref<128x128xbf16, #tpu.memory_space<vmem>>, %arg5: memref<1x128xf32, #tpu.memory_space<vmem>>, %arg6: memref<128x128xbf16, #tpu.memory_space<vmem>>, %arg7: memref<1x128xf32, #tpu.memory_space<vmem>>, %arg8: memref<128x128xbf16, #tpu.memory_space<vmem>>, %arg9: memref<1x128xf32, #tpu.memory_space<vmem>>, %arg10: memref<128x128xbf16, #tpu.memory_space<vmem>>, %arg11: memref<1x128xf32, #tpu.memory_space<vmem>>, %arg12: memref<128x128xbf16, #tpu.memory_space<vmem>>, %arg13: memref<1x128xf32, #tpu.memory_space<vmem>>, %arg14: memref<128x8xf32, #tpu.memory_space<vmem>>, %arg15: memref<128x32xf32, #tpu.memory_space<vmem>>) attributes {dimension_semantics = [#tpu.dimension_semantics<parallel>], iteration_bounds = array<i64: 2>, scalar_prefetch = 0 : i64, scratch_operands = 0 : i64, tpu.core_type = #tpu.core_type<tc>, window_params = [{transform_indices = @transform_0, window_bounds = array<i64: 128, 32>}, {pipeline_mode = #tpu.pipeline_mode<synchronous>, transform_indices = @transform_1, window_bounds = array<i64: 32, 128>}, {pipeline_mode = #tpu.pipeline_mode<synchronous>, transform_indices = @transform_2, window_bounds = array<i64: 1, 128>}, {pipeline_mode = #tpu.pipeline_mode<synchronous>, transform_indices = @transform_3, window_bounds = array<i64: 128, 128>}, {pipeline_mode = #tpu.pipeline_mode<synchronous>, transform_indices = @transform_4, window_bounds = array<i64: 1, 128>}, {pipeline_mode = #tpu.pipeline_mode<synchronous>, transform_indices = @transform_5, window_bounds = array<i64: 128, 128>}, {pipeline_mode = #tpu.pipeline_mode<synchronous>, transform_indices = @transform_6, window_bounds = array<i64: 1, 128>}, {pipeline_mode = #tpu.pipeline_mode<synchronous>, transform_indices = @transform_7, window_bounds = array<i64: 128, 128>}, {pipeline_mode = #tpu.pipeline_mode<synchronous>, transform_indices = @transform_8, window_bounds = array<i64: 1, 128>}, {pipeline_mode = #tpu.pipeline_mode<synchronous>, transform_indices = @transform_9, window_bounds = array<i64: 128, 128>}, {pipeline_mode = #tpu.pipeline_mode<synchronous>, transform_indices = @transform_10, window_bounds = array<i64: 1, 128>}, {pipeline_mode = #tpu.pipeline_mode<synchronous>, transform_indices = @transform_11, window_bounds = array<i64: 128, 128>}, {pipeline_mode = #tpu.pipeline_mode<synchronous>, transform_indices = @transform_12, window_bounds = array<i64: 1, 128>}, {transform_indices = @transform_13, window_bounds = array<i64: 128, 8>}, {transform_indices = @transform_14, window_bounds = array<i64: 128, 32>}]} {
    %c0 = arith.constant 0 : index
    %c0_0 = arith.constant 0 : index
    %0 = vector.load %arg1[%c0, %c0_0] : memref<128x32xf32, #tpu.memory_space<vmem>>, vector<128x32xf32>
    %1 = arith.truncf %0 : vector<128x32xf32> to vector<128x32xbf16>
    %c0_1 = arith.constant 0 : index
    %c0_2 = arith.constant 0 : index
    %2 = vector.load %arg2[%c0_1, %c0_2] : memref<32x128xbf16, #tpu.memory_space<vmem>>, vector<32x128xbf16>
    %cst = arith.constant dense<0.000000e+00> : vector<128x128xf32>
    %3 = tpu.matmul %1, %2, %cst {dimension_numbers = #tpu.dot_dimension_numbers<[1], [0], [0], [1], [0, 0, 1, 1], [], []>} : vector<128x32xbf16>, vector<32x128xbf16>, vector<128x128xf32> -> vector<128x128xf32>
    %c0_3 = arith.constant 0 : index
    %c0_4 = arith.constant 0 : index
    %4 = vector.load %arg3[%c0_3, %c0_4] : memref<1x128xf32, #tpu.memory_space<vmem>>, vector<1x128xf32>
    %5 = vector.broadcast %4 : vector<1x128xf32> to vector<128x128xf32>
    %6 = arith.addf %3, %5 : vector<128x128xf32>
    %cst_5 = arith.constant 0.000000e+00 : f32
    %7 = vector.broadcast %cst_5 : f32 to vector<128x128xf32>
    %8 = arith.cmpf ogt, %6, %7 : vector<128x128xf32>
    %cst_6 = arith.constant 2.000000e-01 : f32
    %9 = vector.broadcast %cst_6 : f32 to vector<128x128xf32>
    %10 = arith.mulf %9, %6 : vector<128x128xf32>
    %11 = arith.select %8, %6, %10 : vector<128x128xi1>, vector<128x128xf32>
    %12 = arith.truncf %11 : vector<128x128xf32> to vector<128x128xbf16>
    %c0_7 = arith.constant 0 : index
    %c0_8 = arith.constant 0 : index
    %13 = vector.load %arg4[%c0_7, %c0_8] : memref<128x128xbf16, #tpu.memory_space<vmem>>, vector<128x128xbf16>
    %cst_9 = arith.constant dense<0.000000e+00> : vector<128x128xf32>
    %14 = tpu.matmul %12, %13, %cst_9 {dimension_numbers = #tpu.dot_dimension_numbers<[1], [0], [0], [1], [0, 0, 1, 1], [], []>} : vector<128x128xbf16>, vector<128x128xbf16>, vector<128x128xf32> -> vector<128x128xf32>
    %c0_10 = arith.constant 0 : index
    %c0_11 = arith.constant 0 : index
    %15 = vector.load %arg5[%c0_10, %c0_11] : memref<1x128xf32, #tpu.memory_space<vmem>>, vector<1x128xf32>
    %16 = vector.broadcast %15 : vector<1x128xf32> to vector<128x128xf32>
    %17 = arith.addf %14, %16 : vector<128x128xf32>
    %18 = math.tanh %17 : vector<128x128xf32>
    %19 = arith.truncf %18 : vector<128x128xf32> to vector<128x128xbf16>
    %c0_12 = arith.constant 0 : index
    %c0_13 = arith.constant 0 : index
    %20 = vector.load %arg6[%c0_12, %c0_13] : memref<128x128xbf16, #tpu.memory_space<vmem>>, vector<128x128xbf16>
    %cst_14 = arith.constant dense<0.000000e+00> : vector<128x128xf32>
    %21 = tpu.matmul %19, %20, %cst_14 {dimension_numbers = #tpu.dot_dimension_numbers<[1], [0], [0], [1], [0, 0, 1, 1], [], []>} : vector<128x128xbf16>, vector<128x128xbf16>, vector<128x128xf32> -> vector<128x128xf32>
    %c0_15 = arith.constant 0 : index
    %c0_16 = arith.constant 0 : index
    %22 = vector.load %arg7[%c0_15, %c0_16] : memref<1x128xf32, #tpu.memory_space<vmem>>, vector<1x128xf32>
    %23 = vector.broadcast %22 : vector<1x128xf32> to vector<128x128xf32>
    %24 = arith.addf %21, %23 : vector<128x128xf32>
    %25 = vector.extract_strided_slice %24 {offsets = [0, 0], sizes = [128, 8], strides = [1, 1]} : vector<128x128xf32> to vector<128x8xf32>
    %c0_17 = arith.constant 0 : index
    %c0_18 = arith.constant 0 : index
    %26 = vector.load %arg14[%c0_17, %c0_18] : memref<128x8xf32, #tpu.memory_space<vmem>>, vector<128x8xf32>
    tpu.vector_store %arg14[%c0_17, %c0_18], %25 {strides = array<i32>} : memref<128x8xf32, #tpu.memory_space<vmem>>, vector<128x8xf32>,
    %27 = arith.truncf %24 : vector<128x128xf32> to vector<128x128xbf16>
    %c0_19 = arith.constant 0 : index
    %c0_20 = arith.constant 0 : index
    %28 = vector.load %arg8[%c0_19, %c0_20] : memref<128x128xbf16, #tpu.memory_space<vmem>>, vector<128x128xbf16>
    %cst_21 = arith.constant dense<0.000000e+00> : vector<128x128xf32>
    %29 = tpu.matmul %27, %28, %cst_21 {dimension_numbers = #tpu.dot_dimension_numbers<[1], [0], [0], [1], [0, 0, 1, 1], [], []>} : vector<128x128xbf16>, vector<128x128xbf16>, vector<128x128xf32> -> vector<128x128xf32>
    %c0_22 = arith.constant 0 : index
    %c0_23 = arith.constant 0 : index
    %30 = vector.load %arg9[%c0_22, %c0_23] : memref<1x128xf32, #tpu.memory_space<vmem>>, vector<1x128xf32>
    %31 = vector.broadcast %30 : vector<1x128xf32> to vector<128x128xf32>
    %32 = arith.addf %29, %31 : vector<128x128xf32>
    %cst_24 = arith.constant 0.000000e+00 : f32
    %33 = vector.broadcast %cst_24 : f32 to vector<128x128xf32>
    %34 = arith.cmpf ogt, %32, %33 : vector<128x128xf32>
    %cst_25 = arith.constant 2.000000e-01 : f32
    %35 = vector.broadcast %cst_25 : f32 to vector<128x128xf32>
    %36 = arith.mulf %35, %32 : vector<128x128xf32>
    %37 = arith.select %34, %32, %36 : vector<128x128xi1>, vector<128x128xf32>
    %38 = arith.truncf %37 : vector<128x128xf32> to vector<128x128xbf16>
    %c0_26 = arith.constant 0 : index
    %c0_27 = arith.constant 0 : index
    %39 = vector.load %arg10[%c0_26, %c0_27] : memref<128x128xbf16, #tpu.memory_space<vmem>>, vector<128x128xbf16>
    %cst_28 = arith.constant dense<0.000000e+00> : vector<128x128xf32>
    %40 = tpu.matmul %38, %39, %cst_28 {dimension_numbers = #tpu.dot_dimension_numbers<[1], [0], [0], [1], [0, 0, 1, 1], [], []>} : vector<128x128xbf16>, vector<128x128xbf16>, vector<128x128xf32> -> vector<128x128xf32>
    %c0_29 = arith.constant 0 : index
    %c0_30 = arith.constant 0 : index
    %41 = vector.load %arg11[%c0_29, %c0_30] : memref<1x128xf32, #tpu.memory_space<vmem>>, vector<1x128xf32>
    %42 = vector.broadcast %41 : vector<1x128xf32> to vector<128x128xf32>
    %43 = arith.addf %40, %42 : vector<128x128xf32>
    %44 = arith.truncf %43 : vector<128x128xf32> to vector<128x128xbf16>
    %c0_31 = arith.constant 0 : index
    %c0_32 = arith.constant 0 : index
    %45 = vector.load %arg12[%c0_31, %c0_32] : memref<128x128xbf16, #tpu.memory_space<vmem>>, vector<128x128xbf16>
    %cst_33 = arith.constant dense<0.000000e+00> : vector<128x128xf32>
    %46 = tpu.matmul %44, %45, %cst_33 {dimension_numbers = #tpu.dot_dimension_numbers<[1], [0], [0], [1], [0, 0, 1, 1], [], []>} : vector<128x128xbf16>, vector<128x128xbf16>, vector<128x128xf32> -> vector<128x128xf32>
    %c0_34 = arith.constant 0 : index
    %c0_35 = arith.constant 0 : index
    %47 = vector.load %arg13[%c0_34, %c0_35] : memref<1x128xf32, #tpu.memory_space<vmem>>, vector<1x128xf32>
    %48 = vector.broadcast %47 : vector<1x128xf32> to vector<128x128xf32>
    %49 = arith.addf %46, %48 : vector<128x128xf32>
    %50 = vector.extract_strided_slice %49 {offsets = [0, 0], sizes = [128, 32], strides = [1, 1]} : vector<128x128xf32> to vector<128x32xf32>
    %c0_36 = arith.constant 0 : index
    %c0_37 = arith.constant 0 : index
    %51 = vector.load %arg15[%c0_36, %c0_37] : memref<128x32xf32, #tpu.memory_space<vmem>>, vector<128x32xf32>
    tpu.vector_store %arg15[%c0_36, %c0_37], %50 {strides = array<i32>} : memref<128x32xf32, #tpu.memory_space<vmem>>, vector<128x32xf32>,
    return
  }
  func.func @transform_0(%arg0: i32) -> (i32, i32) {
    %c0_i32 = arith.constant 0 : i32
    %c0_i32_0 = arith.constant 0 : i32
    return %arg0, %c0_i32 : i32, i32
  }
  func.func @transform_1(%arg0: i32) -> (i32, i32) {
    %c0_i32 = arith.constant 0 : i32
    %c0_i32_0 = arith.constant 0 : i32
    %c0_i32_1 = arith.constant 0 : i32
    return %c0_i32, %c0_i32_0 : i32, i32
  }
  func.func @transform_2(%arg0: i32) -> (i32, i32) {
    %c0_i32 = arith.constant 0 : i32
    %c0_i32_0 = arith.constant 0 : i32
    %c0_i32_1 = arith.constant 0 : i32
    return %c0_i32, %c0_i32_0 : i32, i32
  }
  func.func @transform_3(%arg0: i32) -> (i32, i32) {
    %c0_i32 = arith.constant 0 : i32
    %c0_i32_0 = arith.constant 0 : i32
    %c0_i32_1 = arith.constant 0 : i32
    return %c0_i32, %c0_i32_0 : i32, i32
  }
  func.func @transform_4(%arg0: i32) -> (i32, i32) {
    %c0_i32 = arith.constant 0 : i32
    %c0_i32_0 = arith.constant 0 : i32
    %c0_i32_1 = arith.constant 0 : i32
    return %c0_i32, %c0_i32_0 : i32, i32
  }
  func.func @transform_5(%arg0: i32) -> (i32, i32) {
    %c0_i32 = arith.constant 0 : i32
    %c0_i32_0 = arith.constant 0 : i32
    %c0_i32_1 = arith.constant 0 : i32
    return %c0_i32, %c0_i32_0 : i32, i32
  }
  func.func @transform_6(%arg0: i32) -> (i32, i32) {
    %c0_i32 = arith.constant 0 : i32
    %c0_i32_0 = arith.constant 0 : i32
    %c0_i32_1 = arith.constant 0 : i32
    return %c0_i32, %c0_i32_0 : i32, i32
  }
  func.func @transform_7(%arg0: i32) -> (i32, i32) {
    %c0_i32 = arith.constant 0 : i32
    %c0_i32_0 = arith.constant 0 : i32
    %c0_i32_1 = arith.constant 0 : i32
    return %c0_i32, %c0_i32_0 : i32, i32
  }
  func.func @transform_8(%arg0: i32) -> (i32, i32) {
    %c0_i32 = arith.constant 0 : i32
    %c0_i32_0 = arith.constant 0 : i32
    %c0_i32_1 = arith.constant 0 : i32
    return %c0_i32, %c0_i32_0 : i32, i32
  }
  func.func @transform_9(%arg0: i32) -> (i32, i32) {
    %c0_i32 = arith.constant 0 : i32
    %c0_i32_0 = arith.constant 0 : i32
    %c0_i32_1 = arith.constant 0 : i32
    return %c0_i32, %c0_i32_0 : i32, i32
  }
  func.func @transform_10(%arg0: i32) -> (i32, i32) {
    %c0_i32 = arith.constant 0 : i32
    %c0_i32_0 = arith.constant 0 : i32
    %c0_i32_1 = arith.constant 0 : i32
    return %c0_i32, %c0_i32_0 : i32, i32
  }
  func.func @transform_11(%arg0: i32) -> (i32, i32) {
    %c0_i32 = arith.constant 0 : i32
    %c0_i32_0 = arith.constant 0 : i32
    %c0_i32_1 = arith.constant 0 : i32
    return %c0_i32, %c0_i32_0 : i32, i32
  }
  func.func @transform_12(%arg0: i32) -> (i32, i32) {
    %c0_i32 = arith.constant 0 : i32
    %c0_i32_0 = arith.constant 0 : i32
    %c0_i32_1 = arith.constant 0 : i32
    return %c0_i32, %c0_i32_0 : i32, i32
  }
  func.func @transform_13(%arg0: i32) -> (i32, i32) {
    %c0_i32 = arith.constant 0 : i32
    %c0_i32_0 = arith.constant 0 : i32
    return %arg0, %c0_i32 : i32, i32
  }
  func.func @transform_14(%arg0: i32) -> (i32, i32) {
    %c0_i32 = arith.constant 0 : i32
    %c0_i32_0 = arith.constant 0 : i32
    return %arg0, %c0_i32 : i32, i32
  }
}

</mosaic_0001>

<bundles_post_ra>
// kernel: tpu_custom_call.1
= control target key start
LH: loop header
LB: loop body
LE: loop exit
PB: predicated region body
PF: predicated region fallthrough
CT: control target
= control target key end

     0   :  { %20 = vsyncpa [#allocation3], 0  ;;  %s2367_s29 = smov 0   ;;  %s2732_s0 = inlined_call_operand.vmem [shape: f32[256,32], index: 0, kind: input, shape index: {}]   ;;  %s2733_s1 = inlined_call_operand.hbm [shape: bf16[32,128], index: 1, kind: input, shape index: {}]   ;;  %s2734_s2 = inlined_call_operand.vmem [shape: f32[1,128], index: 2, kind: input, shape index: {}]   ;;  %s2735_s3 = inlined_call_operand.vmem [shape: bf16[128,128], index: 3, kind: input, shape index: {}]   ;;  %s2736_s4 = inlined_call_operand.vmem [shape: f32[1,128], index: 4, kind: input, shape index: {}]   ;;  %s2737_s5 = inlined_call_operand.vmem [shape: bf16[128,128], index: 5, kind: input, shape index: {}]   ;;  %s2738_s6 = inlined_call_operand.vmem [shape: f32[1,128], index: 6, kind: input, shape index: {}]   ;;  %s2739_s7 = inlined_call_operand.vmem [shape: bf16[128,128], index: 7, kind: input, shape index: {}]   ;;  %s2740_s8 = inlined_call_operand.vmem [shape: f32[1,128], index: 8, kind: input, shape index: {}]   ;;  %s2741_s9 = inlined_call_operand.vmem [shape: bf16[128,128], index: 9, kind: input, shape index: {}]   ;;  %s2742_s10 = inlined_call_operand.vmem [shape: f32[1,128], index: 10, kind: input, shape index: {}]   ;;  %s2743_s11 = inlined_call_operand.vmem [shape: bf16[128,128], index: 11, kind: input, shape index: {}]   ;;  %s2744_s12 = inlined_call_operand.vmem [shape: f32[1,128], index: 12, kind: input, shape index: {}]   ;;  %s2745_s13 = inlined_call_operand.vmem [shape: f32[256,8], index: 13, kind: output, shape index: {0}]   ;;  %s2746_s14 = inlined_call_operand.vmem [shape: f32[256,32], index: 14, kind: output, shape index: {1}]  }
   0x1 LB: > { %s1797_s30 = sadd.s32 4294967295, %s2287_s29   ;;  %p1799_p0 = scmp.ge.s32.totalorder %s2287_s29, 1  ;;  %s2287_s29 = sphi %s2367_s29, %s26_s29  }
   0x2   : > { %p361_p1 = scmp.lt.s32.totalorder %s2287_s29, 3  ;;  %s2289_s15 = smov [#allocation2]  }
   0x3   : > { %s373_s16 = sshll.u32 %s2289_s15, 4  ;;  %p2381_p3 = scmp.eq.s32.totalorder %s1797_s30, 0  ;;  %s374_s16 = int_to_ptr.vmem [resolvable:$true] %s373_s16 }
   0x4   : > { %p2375_p2 = pnand %p1799_p0, %p361_p1  ;;  %s2249_s22 = scalar_lea.hbm %s2733_s1, 256 }
   0x5   : > { %s2751_s18 = scalar_select %p2381_p3, 1, 0 }
   0x6   : > { %s2750_s17 = scalar_select %p2375_p2, 1, 0 }
   0x7   : > { %p2158_p4 = pneg %p2375_p2  ;;  %p2250_p6 = scmp.ne.s32.totalorder %s2733_s1, %s2249_s22 }
   0x8   : > { %p2256_p10 = scmp.lt.u32.totalorder %s2249_s22, %s2733_s1 }
   0x9   : > { %p2389_p5 = pnand %p2381_p3, %p2158_p4 }
   0xb   : > { %p2251_p7 = pneg %p2389_p5 }
   0xd   : > { %p2252_p8 = pnand %p2251_p7, %p2250_p6 }
   0xf   : > { %p2253_p9 = pneg %p2252_p8 }
  0x11   : > { %p2258_p11 = pnand %p2256_p10, %p2253_p9 }
  0x13   : > { %2261 = shalt.err (!%p2258_p11)
}
  0x14   : > { %s2262_s27 = scalar_lea.vmem %s374_s16, 256  ;;  %p2270_p1 = scmp.lt.s32.totalorder %s374_s16, %s374_s16 }
  0x15   : > { %p2263_p12 = scmp.ne.s32.totalorder %s374_s16, %s2262_s27  ;;  %p2271_p4 = scmp.lt.s32.totalorder %s2262_s27, %s2262_s27 }
  0x17   : > { %p2265_p13 = pnand %p2263_p12, %p2251_p7  ;;  %p2272_p3 = por %p2271_p4, %p2270_p1 }
  0x19   : > { %p2266_p0 = pneg %p2265_p13 }
  0x1b   : > { %p2273_p2 = pnand %p2272_p3, %p2266_p0 }
  0x1d   : > { %2276 = shalt.err (!%p2273_p2)
}
  0x1e   : > { %s2290_s28 = smov 64   ;;  %s2291_s15 = smov 4  }
  0x1f   : > { %2161 = dma.hbm_to_vmem [thread:$0]  (!%p2389_p5), %s2733_s1, 256, %s374_s16, [#allocation3], %s2290_s28, %s2290_s28, %s2291_s15  }
  0x20   : > { %p2753_p6 = scmp.ne.s32.totalorder %s2750_s17, 0 }
  0x21   : > { %p2754_p8 = scmp.ne.s32.totalorder (!%p2753_p6), %s2751_s18, 0 }
  0x22   : > { %431 = sbr.rel (%p2753_p6) target bundleno = 1411 (0x583), region = 72 }
  0x29   : > { %2282 = dma.done.wait (%p2754_p8), [#allocation3], 256  }
  0x2a   : > { %2284 = vsyncadd (%p2754_p8), [#allocation3], 4294967040  ;;  %s1804_s22 = sshll.u32 %s1797_s30, 4  ;;  %v2175_v0 = vld [vmem:[#allocation2] sm:$0xff]   ;;  %v2176_v1 = vld [vmem:[#allocation2 + $0x8] sm:$0xff]   ;;  %vm548_vm0 = vcmask 261120  }
  0x2b   : > { %p483_p2 = scmp.lt.s32.totalorder %s1804_s22, 31  ;;  %1958 = vmatprep.subr.bf16.mxu0 %v2175_v0  ;;  %v2177_v11 = vld [vmem:[%s2735_s3] sm:$0xff]   ;;  %v2178_v14 = vld [vmem:[%s2735_s3 + $0x8] sm:$0xff]   ;;  %v2179_v17 = vld [vmem:[%s2735_s3 + $0x10] sm:$0xff]  }
  0x2c   : > { %1959 = vmatpush3.bf16.msra.mxu0 %v2175_v0  ;;  %1978 = vmatprep.subr.bf16.mxu1 %v2177_v11  ;;  %v2180_v19 = vld [vmem:[%s2735_s3 + $0x18] sm:$0xff]   ;;  %v2181_v25 = vld [vmem:[%s2735_s3 + $0x20] sm:$0xff]   ;;  %v2182_v31 = vld [vmem:[%s2735_s3 + $0x28] sm:$0xff]  }
  0x2d   : > { %s2756_s22 = smov (!%p483_p2, %s1804_s22), 31  ;;  %1960 = vmatprep.subr.bf16.mxu0 %v2176_v1  ;;  %1979 = vmatpush3.bf16.msra.mxu1 %v2177_v11  ;;  %v2183_v32 = vld [vmem:[%s2735_s3 + $0x30] sm:$0xff]   ;;  %v2184_v33 = vld [vmem:[%s2735_s3 + $0x38] sm:$0xff]   ;;  %v2185_v34 = vld [vmem:[%s2737_s5] sm:$0xff]  }
  0x2e   : > { %s2417_s23 = sshll.u32 %s2756_s22, 3  ;;  %1980 = vmatprep.subr.bf16.mxu1 %v2178_v14  ;;  %v2186_v35 = vld [vmem:[%s2737_s5 + $0x8] sm:$0xff]   ;;  %v2187_v36 = vld [vmem:[%s2737_s5 + $0x10] sm:$0xff]   ;;  %v2188_v37 = vld [vmem:[%s2737_s5 + $0x18] sm:$0xff]  }
  0x2f   : > { %s2423_s16 = scalar_lea.vmem %s2732_s0, %s2417_s23  ;;  %v2488_v38 = vld [vmem:[%s2734_s2] ss:$0 sm:$0xff]  ;;  %s2570_s24 = scalar_lea.vmem %s2745_s13, %s2417_s23 }
  0x30   : > { %v501_v2 = vld [vmem:[%s2423_s16] sm:$0xff]  ;;  %v502_v3 = vld [vmem:[%s2423_s16 + $0x8] sm:$0xff]  ;;  %v503_v5 = vld [vmem:[%s2423_s16 + $0x10] sm:$0xff]  ;;  %1961 = vmatpush3.bf16.msra.mxu0 %v2176_v1  ;;  %s2695_s30 = scalar_lea.vmem %s2746_s14, %s2417_s23 }
  0x31   : > { %v517_v4 = vpack.c.bf16 %v502_v3, %v501_v2  ;;  %v504_v6 = vld [vmem:[%s2423_s16 + $0x18] sm:$0xff]  ;;  %v505_v7 = vld [vmem:[%s2423_s16 + $0x20] sm:$0xff]  ;;  %v506_v8 = vld [vmem:[%s2423_s16 + $0x28] sm:$0xff]  ;;  %1981 = vmatpush3.bf16.msra.mxu1 %v2178_v14  ;;  %2010 = vmatprep.subr.bf16.mxu0 %v2185_v34 }
  0x32   : > { %v518_v9 = vpack.c.bf16 %v504_v6, %v503_v5  ;;  %v519_v10 = vpack.c.bf16 %v506_v8, %v505_v7  ;;  %v507_v12 = vld [vmem:[%s2423_s16 + $0x30] sm:$0xff]  ;;  %v508_v13 = vld [vmem:[%s2423_s16 + $0x38] sm:$0xff]  ;;  %v509_v15 = vld [vmem:[%s2423_s16 + $0x40] sm:$0xff]  ;;  %1982 = vmatprep.subr.bf16.mxu1 %v2179_v17 }
  0x33   : > { %1962 = vmatprep.mubr.msk.bf16.mxu0 %vm548_vm0, %v517_v4  ;;  %v510_v16 = vld [vmem:[%s2423_s16 + $0x48] sm:$0xff]  ;;  %v520_v18 = vpack.c.bf16 %v508_v13, %v507_v12  ;;  %v511_v21 = vld [vmem:[%s2423_s16 + $0x50] sm:$0xff]  ;;  %v512_v22 = vld [vmem:[%s2423_s16 + $0x58] sm:$0xff] }
  0x34   : > { %1963 = vmatmul.mubr.msk.bf16.vlgmr.msra.gmra.mrb[0].mxu0 %vm548_vm0, %v518_v9  ;;  %v521_v20 = vpack.c.bf16 %v510_v16, %v509_v15  ;;  %v513_v23 = vld [vmem:[%s2423_s16 + $0x60] sm:$0xff]  ;;  %v514_v24 = vld [vmem:[%s2423_s16 + $0x68] sm:$0xff]  ;;  %v522_v26 = vpack.c.bf16 %v512_v22, %v511_v21  ;;  %v515_v28 = vld [vmem:[%s2423_s16 + $0x70] sm:$0xff] }
  0x35   : > { %1966 = vmatprep.mubr.msk.bf16.mxu0 %vm548_vm0, %v519_v10  ;;  %1983 = vmatpush3.bf16.msra.mxu1 %v2179_v17  ;;  %v523_v27 = vpack.c.bf16 %v514_v24, %v513_v23  ;;  %v516_v29 = vld [vmem:[%s2423_s16 + $0x78] sm:$0xff] }
  0x36   : > { %1984 = vmatprep.subr.bf16.mxu1 %v2180_v19  ;;  %v524_v30 = vpack.c.bf16 %v516_v29, %v515_v28  ;;  %2011 = vmatpush3.bf16.msra.mxu0 %v2185_v34 }
  0x37   : > { %2012 = vmatprep.subr.bf16.mxu0 %v2186_v35 }
  0x39   : > { %1985 = vmatpush3.bf16.msra.mxu1 %v2180_v19 }
  0x3a   : > { %1986 = vmatprep.subr.bf16.mxu1 %v2181_v25  ;;  %2013 = vmatpush3.bf16.msra.mxu0 %v2186_v35 }
  0x3b   : > { %2014 = vmatprep.subr.bf16.mxu0 %v2187_v36 }
  0x3c   : > { %1967 = vmatmul.mubr.msk.bf16.gmra.mrb[4].mxu0 %vm548_vm0, %v520_v18 }
  0x3d   : > { %1970 = vmatprep.mubr.msk.bf16.mxu0 %vm548_vm0, %v521_v20  ;;  %1987 = vmatpush3.bf16.msra.mxu1 %v2181_v25 }
  0x3e   : > { %1988 = vmatprep.subr.bf16.mxu1 %v2182_v31  ;;  %2015 = vmatpush3.bf16.msra.mxu0 %v2187_v36 }
  0x3f   : > { %2016 = vmatprep.subr.bf16.mxu0 %v2188_v37 }
  0x41   : > { %1989 = vmatpush3.bf16.msra.mxu1 %v2182_v31 }
  0x42   : > { %1990 = vmatprep.subr.bf16.mxu1 %v2183_v32  ;;  %2017 = vmatpush3.bf16.msra.mxu0 %v2188_v37 }
  0x44   : > { %1971 = vmatmul.mubr.msk.bf16.gmra.mrb[8].mxu0 %vm548_vm0, %v522_v26 }
  0x45   : > { %1974 = vmatprep.mubr.msk.bf16.mxu0 %vm548_vm0, %v523_v27  ;;  %1991 = vmatpush3.bf16.msra.mxu1 %v2183_v32 }
  0x46   : > { %1992 = vmatprep.subr.bf16.mxu1 %v2184_v33 }
  0x49   : > { %1993 = vmatpush3.bf16.msra.mxu1 %v2184_v33 }
  0x4c   : > { %1975 = vmatmul.mubr.msk.bf16.gmra.mrb[12].mxu0 %vm548_vm0, %v524_v30 }
 0x107   : > { %v1964_v39 = vpop.f32.mrb[0].mxu0 }
 0x108   : > { %v616_v40 = vadd.f32 %v1964_v39, %v2488_v38  ;;  %v607_v41 = vpop.f32.mrb[1].mxu0 }
 0x109   : > { %v608_v42 = vadd.f32 %v2488_v38, %v607_v41  ;;  %v1965_v43 = vpop.f32.mrb[2].mxu0 }
 0x10a   : > { %v688_v44 = vmul.f32 0.2, %v616_v40  ;;  %v619_v45 = vadd.f32 %v1965_v43, %v2488_v38  ;;  %v610_v46 = vpop.f32.mrb[3].mxu0  ;;  %vm672_vm1 = vcmp.gt.f32.partialorder %v616_v40, 0.0 }
 0x10b   : > { %v686_v47 = vmul.f32 0.2, %v608_v42  ;;  %v611_v48 = vadd.f32 %v2488_v38, %v610_v46  ;;  %vm670_vm3 = vcmp.gt.f32.partialorder %v608_v42, 0.0 }
 0x10c   : > { %vm673_vm2 = vcmp.gt.f32.partialorder %v619_v45, 0.0  ;;  %v689_v49 = vmul.f32 0.2, %v619_v45  ;;  %v704_v51 = vsel %vm672_vm1, %v616_v40, %v688_v44 }
 0x10d   : > { %v687_v50 = vmul.f32 0.2, %v611_v48  ;;  %vm671_vm4 = vcmp.gt.f32.partialorder %v611_v48, 0.0  ;;  %v702_v54 = vsel %vm670_vm3, %v608_v42, %v686_v47 }
 0x10e   : > { %v705_v52 = vsel %vm673_vm2, %v619_v45, %v689_v49  ;;  %v2191_v49 = vld [vmem:[%s2737_s5 + $0x30] sm:$0xff]   ;;  %vm1086_vm2 = vcmask 64512  }
 0x10f   : > { %v1968_v53 = vpop.f32.mrb[4].mxu0  ;;  %v703_v55 = vsel %vm671_vm4, %v611_v48, %v687_v50  ;;  %v719_v56 = vpack.c.bf16 %v705_v52, %v704_v51  ;;  %v2189_v48 = vld [vmem:[%s2737_s5 + $0x20] sm:$0xff]   ;;  %v2192_v50 = vld [vmem:[%s2737_s5 + $0x38] sm:$0xff]   ;;  %v2194_v52 = vld [vmem:[%s2739_s7 + $0x8] sm:$0xff]  }
 0x110   : > { %v632_v57 = vadd.f32 %v1968_v53, %v2488_v38  ;;  %v623_v58 = vpop.f32.mrb[5].mxu0  ;;  %v718_v59 = vpack.c.bf16 %v703_v55, %v702_v54  ;;  %2018 = vmatprep.subr.bf16.mxu0 %v2189_v48  ;;  %v2193_v51 = vld [vmem:[%s2739_s7] sm:$0xff]   ;;  %v2195_v53 = vld [vmem:[%s2739_s7 + $0x10] sm:$0xff]   ;;  %v2196_v54 = vld [vmem:[%s2739_s7 + $0x18] sm:$0xff]  }
 0x111   : > { %v624_v60 = vadd.f32 %v2488_v38, %v623_v58  ;;  %v1969_v61 = vpop.f32.mrb[6].mxu0  ;;  %2019 = vmatpush3.bf16.msra.mxu0 %v2189_v48  ;;  %2042 = vmatprep.subr.bf16.mxu1 %v2193_v51  ;;  %v2197_v55 = vld [vmem:[%s2739_s7 + $0x20] sm:$0xff]  }
 0x112   : > { %v692_v62 = vmul.f32 0.2, %v632_v57  ;;  %v635_v63 = vadd.f32 %v1969_v61, %v2488_v38  ;;  %v626_v0 = vpop.f32.mrb[7].mxu0  ;;  %1994 = vmatprep.mubr.bf16.mxu1 %v718_v59  ;;  %vm676_vm5 = vcmp.gt.f32.partialorder %v632_v57, 0.0 }
 0x113   : > { %v690_v1 = vmul.f32 0.2, %v624_v60  ;;  %v627_v2 = vadd.f32 %v2488_v38, %v626_v0  ;;  %1995 = vmatmul.mubr.bf16.vlgmr.msra.gmra.mrb[0].mxu1 %v719_v56  ;;  %vm674_vm6 = vcmp.gt.f32.partialorder %v624_v60, 0.0  ;;  %v2198_v56 = vld [vmem:[%s2739_s7 + $0x28] sm:$0xff]  }
 0x114   : > { %vm677_vm7 = vcmp.gt.f32.partialorder %v635_v63, 0.0  ;;  %v693_v3 = vmul.f32 0.2, %v635_v63  ;;  %v708_v5 = vsel %vm676_vm5, %v632_v57, %v692_v62  ;;  %2043 = vmatpush3.bf16.msra.mxu1 %v2193_v51  ;;  %v1821_v57 = vld [vmem:[%s2736_s4] ss:$0 sm:$0xff]  ;;  %v2200_v51 = vld [vmem:[%s2739_s7 + $0x38] sm:$0xff]  }
 0x115   : > { %vm675_vm8 = vcmp.gt.f32.partialorder %v627_v2, 0.0  ;;  %v691_v4 = vmul.f32 0.2, %v627_v2  ;;  %v706_v8 = vsel %vm674_vm6, %v624_v60, %v690_v1  ;;  %2044 = vmatprep.subr.bf16.mxu1 %v2194_v52 }
 0x116   : > { %v709_v6 = vsel %vm677_vm7, %v635_v63, %v693_v3 }
 0x117   : > { %v1972_v7 = vpop.f32.mrb[8].mxu0  ;;  %v707_v9 = vsel %vm675_vm8, %v627_v2, %v691_v4  ;;  %v721_v10 = vpack.c.bf16 %v709_v6, %v708_v5 }
 0x118   : > { %v648_v11 = vadd.f32 %v1972_v7, %v2488_v38  ;;  %v639_v12 = vpop.f32.mrb[9].mxu0  ;;  %v720_v13 = vpack.c.bf16 %v707_v9, %v706_v8  ;;  %2045 = vmatpush3.bf16.msra.mxu1 %v2194_v52  ;;  %v2201_v52 = vld [vmem:[%s2741_s9] sm:$0xff]  }
 0x119   : > { %v640_v14 = vadd.f32 %v2488_v38, %v639_v12  ;;  %v1973_v15 = vpop.f32.mrb[10].mxu0  ;;  %2046 = vmatprep.subr.bf16.mxu1 %v2195_v53 }
 0x11a   : > { %v696_v16 = vmul.f32 0.2, %v648_v11  ;;  %v651_v17 = vadd.f32 %v1973_v15, %v2488_v38  ;;  %v642_v18 = vpop.f32.mrb[11].mxu0  ;;  %1998 = vmatprep.mubr.bf16.mxu1 %v720_v13  ;;  %vm680_vm9 = vcmp.gt.f32.partialorder %v648_v11, 0.0 }
 0x11b   : > { %v694_v19 = vmul.f32 0.2, %v640_v14  ;;  %v643_v20 = vadd.f32 %v2488_v38, %v642_v18  ;;  %1999 = vmatmul.mubr.bf16.gmra.mrb[4].mxu1 %v721_v10  ;;  %vm678_vm10 = vcmp.gt.f32.partialorder %v640_v14, 0.0 }
 0x11c   : > { %vm681_vm11 = vcmp.gt.f32.partialorder %v651_v17, 0.0  ;;  %v697_v21 = vmul.f32 0.2, %v651_v17  ;;  %v712_v23 = vsel %vm680_vm9, %v648_v11, %v696_v16  ;;  %2047 = vmatpush3.bf16.msra.mxu1 %v2195_v53  ;;  %v2202_v53 = vld [vmem:[%s2741_s9 + $0x8] sm:$0xff]  }
 0x11d   : > { %vm679_vm12 = vcmp.gt.f32.partialorder %v643_v20, 0.0  ;;  %v695_v22 = vmul.f32 0.2, %v643_v20  ;;  %v710_v26 = vsel %vm678_vm10, %v640_v14, %v694_v19  ;;  %2048 = vmatprep.subr.bf16.mxu1 %v2196_v54 }
 0x11e   : > { %v713_v24 = vsel %vm681_vm11, %v651_v17, %v697_v21 }
 0x11f   : > { %v1976_v25 = vpop.f32.mrb[12].mxu0  ;;  %v711_v27 = vsel %vm679_vm12, %v643_v20, %v695_v22  ;;  %v723_v28 = vpack.c.bf16 %v713_v24, %v712_v23 }
 0x120   : > { %v664_v29 = vadd.f32 %v1976_v25, %v2488_v38  ;;  %v655_v30 = vpop.f32.mrb[13].mxu0  ;;  %v722_v31 = vpack.c.bf16 %v711_v27, %v710_v26  ;;  %2049 = vmatpush3.bf16.msra.mxu1 %v2196_v54  ;;  %v2203_v54 = vld [vmem:[%s2741_s9 + $0x10] sm:$0xff]  }
 0x121   : > { %v656_v32 = vadd.f32 %v2488_v38, %v655_v30  ;;  %v1977_v33 = vpop.f32.mrb[14].mxu0  ;;  %2050 = vmatprep.subr.bf16.mxu1 %v2197_v55 }
 0x122   : > { %v700_v34 = vmul.f32 0.2, %v664_v29  ;;  %v667_v35 = vadd.f32 %v1977_v33, %v2488_v38  ;;  %v658_v36 = vpop.f32.mrb[15].mxu0  ;;  %2002 = vmatprep.mubr.bf16.mxu1 %v722_v31  ;;  %vm684_vm13 = vcmp.gt.f32.partialorder %v664_v29, 0.0 }
 0x123   : > { %v698_v37 = vmul.f32 0.2, %v656_v32  ;;  %v659_v39 = vadd.f32 %v2488_v38, %v658_v36  ;;  %2003 = vmatmul.mubr.bf16.gmra.mrb[8].mxu1 %v723_v28  ;;  %vm682_vm14 = vcmp.gt.f32.partialorder %v656_v32, 0.0  ;;  %v2190_v38 = vld [vmem:[%s2737_s5 + $0x28] sm:$0xff]  }
 0x124   : > { %vm685_vm15 = vcmp.gt.f32.partialorder %v667_v35, 0.0  ;;  %v701_v40 = vmul.f32 0.2, %v667_v35  ;;  %v716_v42 = vsel %vm684_vm13, %v664_v29, %v700_v34  ;;  %2020 = vmatprep.subr.bf16.mxu0 %v2190_v38  ;;  %2051 = vmatpush3.bf16.msra.mxu1 %v2197_v55  ;;  %v2204_v55 = vld [vmem:[%s2741_s9 + $0x18] sm:$0xff]  }
 0x125   : > { %vm683_vm1 = vcmp.gt.f32.partialorder %v659_v39, 0.0  ;;  %v699_v41 = vmul.f32 0.2, %v659_v39  ;;  %v714_v44 = vsel %vm682_vm14, %v656_v32, %v698_v37  ;;  %2021 = vmatpush3.bf16.msra.mxu0 %v2190_v38  ;;  %2052 = vmatprep.subr.bf16.mxu1 %v2198_v56 }
 0x126   : > { %v717_v43 = vsel %vm685_vm15, %v667_v35, %v701_v40  ;;  %2022 = vmatprep.subr.bf16.mxu0 %v2191_v49 }
 0x127   : > { %v715_v45 = vsel %vm683_vm1, %v659_v39, %v699_v41  ;;  %v725_v46 = vpack.c.bf16 %v717_v43, %v716_v42 }
 0x128   : > { %v724_v47 = vpack.c.bf16 %v715_v45, %v714_v44  ;;  %2053 = vmatpush3.bf16.msra.mxu1 %v2198_v56  ;;  %v2205_v56 = vld [vmem:[%s2741_s9 + $0x20] sm:$0xff]  }
 0x129   : > { %2023 = vmatpush3.bf16.msra.mxu0 %v2191_v49 }
 0x12a   : > { %2006 = vmatprep.mubr.bf16.mxu1 %v724_v47  ;;  %2024 = vmatprep.subr.bf16.mxu0 %v2192_v50 }
 0x12b   : > { %2007 = vmatmul.mubr.bf16.gmra.mrb[12].mxu1 %v725_v46 }
 0x12d   : > { %2025 = vmatpush3.bf16.msra.mxu0 %v2192_v50  ;;  %v2199_v50 = vld [vmem:[%s2739_s7 + $0x30] sm:$0xff]  }
 0x12e   : > { %2054 = vmatprep.subr.bf16.mxu1 %v2199_v50  ;;  %2074 = vmatprep.subr.bf16.mxu0 %v2201_v52 }
 0x12f   : > { %2055 = vmatpush3.bf16.msra.mxu1 %v2199_v50 }
 0x130   : > { %2056 = vmatprep.subr.bf16.mxu1 %v2200_v51 }
 0x133   : > { %2057 = vmatpush3.bf16.msra.mxu1 %v2200_v51 }
 0x1e6   : > { %v1996_v58 = vpop.f32.mrb[0].mxu1 }
 0x1e7   : > { %v840_v59 = vadd.f32 %v1996_v58, %v1821_v57  ;;  %v831_v60 = vpop.f32.mrb[1].mxu1  ;;  %v1830_v58 = vld [vmem:[%s2738_s6] ss:$0 sm:$0xff] }
 0x1e8   : > { %v832_v61 = vadd.f32 %v1821_v57, %v831_v60  ;;  %v1997_v62 = vpop.f32.mrb[2].mxu1 }
 0x1e9   : > { %2217 = vtanh.f32 %v840_v59  ;;  %v843_v63 = vadd.f32 %v1997_v62, %v1821_v57  ;;  %v834_v0 = vpop.f32.mrb[3].mxu1 }
 0x1ea   : > { %2219 = vtanh.f32 %v832_v61  ;;  %v835_v1 = vadd.f32 %v1821_v57, %v834_v0 }
 0x1eb   : > { %2221 = vtanh.f32 %v843_v63 }
 0x1ec   : > { %2223 = vtanh.f32 %v835_v1 }
 0x1ee   : > { %v2000_v2 = vpop.f32.mrb[4].mxu1 }
 0x1ef   : > { %v856_v3 = vadd.f32 %v2000_v2, %v1821_v57  ;;  %v847_v4 = vpop.f32.mrb[5].mxu1 }
 0x1f0   : > { %v848_v5 = vadd.f32 %v1821_v57, %v847_v4  ;;  %v2001_v6 = vpop.f32.mrb[6].mxu1 }
 0x1f1   : > { %2225 = vtanh.f32 %v856_v3  ;;  %v859_v7 = vadd.f32 %v2001_v6, %v1821_v57  ;;  %v850_v8 = vpop.f32.mrb[7].mxu1 }
 0x1f2   : > { %2227 = vtanh.f32 %v848_v5  ;;  %v851_v9 = vadd.f32 %v1821_v57, %v850_v8 }
 0x1f3   : > { %v2218_v10 = vpop.eup %2217  ;;  %2229 = vtanh.f32 %v859_v7 }
 0x1f4   : > { %v2220_v11 = vpop.eup %2219  ;;  %2231 = vtanh.f32 %v851_v9 }
 0x1f5   : > { %v2222_v12 = vpop.eup %2221 }
 0x1f6   : > { %v2224_v13 = vpop.eup %2223  ;;  %v2004_v14 = vpop.f32.mrb[8].mxu1  ;;  %v911_v15 = vpack.c.bf16 %v2222_v12, %v2218_v10 }
 0x1f7   : > { %v872_v16 = vadd.f32 %v2004_v14, %v1821_v57  ;;  %v863_v17 = vpop.f32.mrb[9].mxu1  ;;  %v910_v18 = vpack.c.bf16 %v2224_v13, %v2220_v11 }
 0x1f8   : > { %v864_v19 = vadd.f32 %v1821_v57, %v863_v17  ;;  %v2005_v20 = vpop.f32.mrb[10].mxu1 }
 0x1f9   : > { %2233 = vtanh.f32 %v872_v16  ;;  %v875_v21 = vadd.f32 %v2005_v20, %v1821_v57  ;;  %v866_v22 = vpop.f32.mrb[11].mxu1  ;;  %2026 = vmatprep.mubr.bf16.mxu0 %v910_v18 }
 0x1fa   : > { %2235 = vtanh.f32 %v864_v19  ;;  %v867_v23 = vadd.f32 %v1821_v57, %v866_v22  ;;  %2027 = vmatmul.mubr.bf16.vlgmr.msra.gmra.mrb[16].mxu0 %v911_v15 }
 0x1fb   : > { %v2226_v24 = vpop.eup %2225  ;;  %2237 = vtanh.f32 %v875_v21  ;;  %2075 = vmatpush3.bf16.msra.mxu0 %v2201_v52 }
 0x1fc   : > { %v2228_v25 = vpop.eup %2227  ;;  %2239 = vtanh.f32 %v867_v23  ;;  %2076 = vmatprep.subr.bf16.mxu0 %v2202_v53 }
 0x1fd   : > { %v2230_v26 = vpop.eup %2229 }
 0x1fe   : > { %v2232_v27 = vpop.eup %2231  ;;  %v2008_v28 = vpop.f32.mrb[12].mxu1  ;;  %v913_v29 = vpack.c.bf16 %v2230_v26, %v2226_v24 }
 0x1ff   : > { %v888_v30 = vadd.f32 %v2008_v28, %v1821_v57  ;;  %v879_v31 = vpop.f32.mrb[13].mxu1  ;;  %v912_v32 = vpack.c.bf16 %v2232_v27, %v2228_v25  ;;  %2077 = vmatpush3.bf16.msra.mxu0 %v2202_v53 }
 0x200   : > { %v880_v33 = vadd.f32 %v1821_v57, %v879_v31  ;;  %v2009_v34 = vpop.f32.mrb[14].mxu1  ;;  %2078 = vmatprep.subr.bf16.mxu0 %v2203_v54 }
 0x201   : > { %2241 = vtanh.f32 %v888_v30  ;;  %v891_v35 = vadd.f32 %v2009_v34, %v1821_v57  ;;  %v882_v36 = vpop.f32.mrb[15].mxu1  ;;  %2030 = vmatprep.mubr.bf16.mxu0 %v912_v32 }
 0x202   : > { %2243 = vtanh.f32 %v880_v33  ;;  %v883_v37 = vadd.f32 %v1821_v57, %v882_v36  ;;  %2031 = vmatmul.mubr.bf16.gmra.mrb[20].mxu0 %v913_v29  ;;  %v2206_v57 = vld [vmem:[%s2741_s9 + $0x28] sm:$0xff]   ;;  %v2208_v36 = vld [vmem:[%s2741_s9 + $0x38] sm:$0xff]  }
 0x203   : > { %v2234_v39 = vpop.eup %2233  ;;  %2245 = vtanh.f32 %v891_v35  ;;  %2079 = vmatpush3.bf16.msra.mxu0 %v2203_v54  ;;  %v2207_v35 = vld [vmem:[%s2741_s9 + $0x30] sm:$0xff]  }
 0x204   : > { %v2236_v40 = vpop.eup %2235  ;;  %2247 = vtanh.f32 %v883_v37  ;;  %2080 = vmatprep.subr.bf16.mxu0 %v2204_v55  ;;  %v2209_v37 = vld [vmem:[%s2743_s11] sm:$0xff]  }
 0x205   : > { %v2238_v41 = vpop.eup %2237  ;;  %2138 = vmatprep.subr.bf16.mxu1 %v2209_v37 }
 0x206   : > { %v2240_v42 = vpop.eup %2239  ;;  %v915_v43 = vpack.c.bf16 %v2238_v41, %v2234_v39  ;;  %v2616_v39 = vld [vmem:[%s2743_s11 + $0x8] sm:$0xff]   ;;  %v2629_v41 = vld [vmem:[%s2743_s11 + $0x18] sm:$0xff]  }
 0x207   : > { %v914_v44 = vpack.c.bf16 %v2240_v42, %v2236_v40  ;;  %2081 = vmatpush3.bf16.msra.mxu0 %v2204_v55  ;;  %v2622_v40 = vld [vmem:[%s2743_s11 + $0x10] sm:$0xff]   ;;  %v2636_v42 = vld [vmem:[%s2743_s11 + $0x20] sm:$0xff]  }
 0x208   : > { %2082 = vmatprep.subr.bf16.mxu0 %v2205_v56 }
 0x209   : > { %2034 = vmatprep.mubr.bf16.mxu0 %v914_v44  ;;  %v2651_v44 = vld [vmem:[%s2740_s8] ss:$0 sm:$0xff] }
 0x20a   : > { %2035 = vmatmul.mubr.bf16.gmra.mrb[24].mxu0 %v915_v43  ;;  %v2643_v43 = vld [vmem:[%s2743_s11 + $0x28] sm:$0xff]  }
 0x20b   : > { %v2242_v45 = vpop.eup %2241  ;;  %2083 = vmatpush3.bf16.msra.mxu0 %v2205_v56 }
 0x20c   : > { %v2244_v46 = vpop.eup %2243  ;;  %2084 = vmatprep.subr.bf16.mxu0 %v2206_v57 }
 0x20d   : > { %v2246_v47 = vpop.eup %2245 }
 0x20e   : > { %v2248_v48 = vpop.eup %2247  ;;  %v917_v38 = vpack.c.bf16 %v2246_v47, %v2242_v45 }
 0x20f   : > { %v916_v49 = vpack.c.bf16 %v2248_v48, %v2244_v46  ;;  %2085 = vmatpush3.bf16.msra.mxu0 %v2206_v57 }
 0x210   : > { %2086 = vmatprep.subr.bf16.mxu0 %v2207_v35 }
 0x211   : > { %2038 = vmatprep.mubr.bf16.mxu0 %v916_v49 }
 0x212   : > { %2039 = vmatmul.mubr.bf16.gmra.mrb[28].mxu0 %v917_v38 }
 0x213   : > { %2087 = vmatpush3.bf16.msra.mxu0 %v2207_v35 }
 0x214   : > { %2088 = vmatprep.subr.bf16.mxu0 %v2208_v36 }
 0x217   : > { %2089 = vmatpush3.bf16.msra.mxu0 %v2208_v36 }
 0x218   : > { %2106 = vmatprep.subr.bf16.mxu0 %v2209_v37 }
 0x2cd   : > { %v2028_v59 = vpop.f32.mrb[16].mxu0 }
 0x2ce   : > { %v1032_v60 = vadd.f32 %v2028_v59, %v1830_v58  ;;  %v1023_v61 = vpop.f32.mrb[17].mxu0 }
 0x2cf   : > { %v1024_v62 = vadd.f32 %v1830_v58, %v1023_v61  ;;  %v2029_v63 = vpop.f32.mrb[18].mxu0 }
 0x2d0   : > { %1089 = vst.msk [vmem:[%s2570_s24 + $0x10] sm:$0xff] %vm1086_vm2, %v1032_v60  ;;  %v1035_v0 = vadd.f32 %v2029_v63, %v1830_v58  ;;  %v1026_v1 = vpop.f32.mrb[19].mxu0 }
 0x2d1   : > { %1087 = vst.msk [vmem:[%s2570_s24] sm:$0xff] %vm1086_vm2, %v1024_v62  ;;  %v1027_v2 = vadd.f32 %v1830_v58, %v1026_v1 }
 0x2d2   : > { %1090 = vst.msk [vmem:[%s2570_s24 + $0x18] sm:$0xff] %vm1086_vm2, %v1035_v0  ;;  %v1104_v3 = vpack.c.bf16 %v1035_v0, %v1032_v60 }
 0x2d3   : > { %1088 = vst.msk [vmem:[%s2570_s24 + $0x8] sm:$0xff] %vm1086_vm2, %v1027_v2  ;;  %v1103_v4 = vpack.c.bf16 %v1027_v2, %v1024_v62 }
 0x2d5   : > { %v2032_v5 = vpop.f32.mrb[20].mxu0  ;;  %2058 = vmatprep.mubr.bf16.mxu1 %v1103_v4 }
 0x2d6   : > { %v1048_v6 = vadd.f32 %v2032_v5, %v1830_v58  ;;  %v1039_v7 = vpop.f32.mrb[21].mxu0  ;;  %2059 = vmatmul.mubr.bf16.vlgmr.msra.gmra.mrb[16].mxu1 %v1104_v3 }
 0x2d7   : > { %v1040_v8 = vadd.f32 %v1830_v58, %v1039_v7  ;;  %v2033_v9 = vpop.f32.mrb[22].mxu0  ;;  %2146 = vmatpush3.bf16.msra.mxu1 %v2209_v37 }
 0x2d8   : > { %1093 = vst.msk [vmem:[%s2570_s24 + $0x30] sm:$0xff] %vm1086_vm2, %v1048_v6  ;;  %v1051_v10 = vadd.f32 %v2033_v9, %v1830_v58  ;;  %v1042_v11 = vpop.f32.mrb[23].mxu0  ;;  %2139 = vmatprep.subr.bf16.mxu1 %v2616_v39 }
 0x2d9   : > { %1091 = vst.msk [vmem:[%s2570_s24 + $0x20] sm:$0xff] %vm1086_vm2, %v1040_v8  ;;  %v1043_v12 = vadd.f32 %v1830_v58, %v1042_v11 }
 0x2da   : > { %1094 = vst.msk [vmem:[%s2570_s24 + $0x38] sm:$0xff] %vm1086_vm2, %v1051_v10  ;;  %v1106_v13 = vpack.c.bf16 %v1051_v10, %v1048_v6 }
 0x2db   : > { %1092 = vst.msk [vmem:[%s2570_s24 + $0x28] sm:$0xff] %vm1086_vm2, %v1043_v12  ;;  %v1105_v14 = vpack.c.bf16 %v1043_v12, %v1040_v8  ;;  %2147 = vmatpush3.bf16.msra.mxu1 %v2616_v39 }
 0x2dc   : > { %2140 = vmatprep.subr.bf16.mxu1 %v2622_v40 }
 0x2dd   : > { %v2036_v15 = vpop.f32.mrb[24].mxu0  ;;  %2062 = vmatprep.mubr.bf16.mxu1 %v1105_v14 }
 0x2de   : > { %v1064_v16 = vadd.f32 %v2036_v15, %v1830_v58  ;;  %v1055_v17 = vpop.f32.mrb[25].mxu0  ;;  %2063 = vmatmul.mubr.bf16.gmra.mrb[20].mxu1 %v1106_v13 }
 0x2df   : > { %v1056_v18 = vadd.f32 %v1830_v58, %v1055_v17  ;;  %v2037_v19 = vpop.f32.mrb[26].mxu0  ;;  %2148 = vmatpush3.bf16.msra.mxu1 %v2622_v40 }
 0x2e0   : > { %1097 = vst.msk [vmem:[%s2570_s24 + $0x50] sm:$0xff] %vm1086_vm2, %v1064_v16  ;;  %v1067_v20 = vadd.f32 %v2037_v19, %v1830_v58  ;;  %v1058_v21 = vpop.f32.mrb[27].mxu0  ;;  %2141 = vmatprep.subr.bf16.mxu1 %v2629_v41 }
 0x2e1   : > { %1095 = vst.msk [vmem:[%s2570_s24 + $0x40] sm:$0xff] %vm1086_vm2, %v1056_v18  ;;  %v1059_v22 = vadd.f32 %v1830_v58, %v1058_v21 }
 0x2e2   : > { %1098 = vst.msk [vmem:[%s2570_s24 + $0x58] sm:$0xff] %vm1086_vm2, %v1067_v20  ;;  %v1108_v23 = vpack.c.bf16 %v1067_v20, %v1064_v16 }
 0x2e3   : > { %1096 = vst.msk [vmem:[%s2570_s24 + $0x48] sm:$0xff] %vm1086_vm2, %v1059_v22  ;;  %v1107_v24 = vpack.c.bf16 %v1059_v22, %v1056_v18  ;;  %2149 = vmatpush3.bf16.msra.mxu1 %v2629_v41 }
 0x2e4   : > { %2142 = vmatprep.subr.bf16.mxu1 %v2636_v42 }
 0x2e5   : > { %v2040_v25 = vpop.f32.mrb[28].mxu0  ;;  %2066 = vmatprep.mubr.bf16.mxu1 %v1107_v24 }
 0x2e6   : > { %v1080_v26 = vadd.f32 %v2040_v25, %v1830_v58  ;;  %v1071_v27 = vpop.f32.mrb[29].mxu0  ;;  %2067 = vmatmul.mubr.bf16.gmra.mrb[24].mxu1 %v1108_v23 }
 0x2e7   : > { %v1072_v28 = vadd.f32 %v1830_v58, %v1071_v27  ;;  %v2041_v29 = vpop.f32.mrb[30].mxu0  ;;  %2150 = vmatpush3.bf16.msra.mxu1 %v2636_v42 }
 0x2e8   : > { %1101 = vst.msk [vmem:[%s2570_s24 + $0x70] sm:$0xff] %vm1086_vm2, %v1080_v26  ;;  %v1083_v30 = vadd.f32 %v2041_v29, %v1830_v58  ;;  %v1074_v31 = vpop.f32.mrb[31].mxu0  ;;  %2143 = vmatprep.subr.bf16.mxu1 %v2643_v43 }
 0x2e9   : > { %1099 = vst.msk [vmem:[%s2570_s24 + $0x60] sm:$0xff] %vm1086_vm2, %v1072_v28  ;;  %v1075_v32 = vadd.f32 %v1830_v58, %v1074_v31 }
 0x2ea   : > { %1102 = vst.msk [vmem:[%s2570_s24 + $0x78] sm:$0xff] %vm1086_vm2, %v1083_v30  ;;  %v1110_v33 = vpack.c.bf16 %v1083_v30, %v1080_v26 }
 0x2eb   : > { %1100 = vst.msk [vmem:[%s2570_s24 + $0x68] sm:$0xff] %vm1086_vm2, %v1075_v32  ;;  %v1109_v34 = vpack.c.bf16 %v1075_v32, %v1072_v28  ;;  %2151 = vmatpush3.bf16.msra.mxu1 %v2643_v43 }
 0x2ed   : > { %2070 = vmatprep.mubr.bf16.mxu1 %v1109_v34 }
 0x2ee   : > { %2071 = vmatmul.mubr.bf16.gmra.mrb[28].mxu1 %v1110_v33 }
 0x3a9   : > { %v2060_v45 = vpop.f32.mrb[16].mxu1 }
 0x3aa   : > { %v1225_v46 = vadd.f32 %v2060_v45, %v2651_v44  ;;  %v1216_v47 = vpop.f32.mrb[17].mxu1 }
 0x3ab   : > { %v1217_v48 = vadd.f32 %v2651_v44, %v1216_v47  ;;  %v2061_v38 = vpop.f32.mrb[18].mxu1 }
 0x3ac   : > { %v1297_v49 = vmul.f32 0.2, %v1225_v46  ;;  %v1228_v50 = vadd.f32 %v2061_v38, %v2651_v44  ;;  %v1219_v51 = vpop.f32.mrb[19].mxu1  ;;  %vm1281_vm3 = vcmp.gt.f32.partialorder %v1225_v46, 0.0 }
 0x3ad   : > { %v1295_v52 = vmul.f32 0.2, %v1217_v48  ;;  %v1220_v53 = vadd.f32 %v2651_v44, %v1219_v51  ;;  %vm1279_vm4 = vcmp.gt.f32.partialorder %v1217_v48, 0.0 }
 0x3ae   : > { %vm1282_vm5 = vcmp.gt.f32.partialorder %v1228_v50, 0.0  ;;  %v1298_v54 = vmul.f32 0.2, %v1228_v50  ;;  %v1313_v56 = vsel %vm1281_vm3, %v1225_v46, %v1297_v49 }
 0x3af   : > { %vm1280_vm6 = vcmp.gt.f32.partialorder %v1220_v53, 0.0  ;;  %v1296_v55 = vmul.f32 0.2, %v1220_v53  ;;  %v1311_v60 = vsel %vm1279_vm4, %v1217_v48, %v1295_v52 }
 0x3b0   : > { %v1314_v57 = vsel %vm1282_vm5, %v1228_v50, %v1298_v54 }
 0x3b1   : > { %v1328_v58 = vpack.c.bf16 %v1314_v57, %v1313_v56  ;;  %v2064_v59 = vpop.f32.mrb[20].mxu1  ;;  %v1312_v61 = vsel %vm1280_vm6, %v1220_v53, %v1296_v55 }
 0x3b2   : > { %v1241_v62 = vadd.f32 %v2064_v59, %v2651_v44  ;;  %v1232_v63 = vpop.f32.mrb[21].mxu1  ;;  %v1327_v0 = vpack.c.bf16 %v1312_v61, %v1311_v60 }
 0x3b3   : > { %v1233_v1 = vadd.f32 %v2651_v44, %v1232_v63  ;;  %v2065_v2 = vpop.f32.mrb[22].mxu1 }
 0x3b4   : > { %v1301_v3 = vmul.f32 0.2, %v1241_v62  ;;  %v1244_v4 = vadd.f32 %v2065_v2, %v2651_v44  ;;  %v1235_v5 = vpop.f32.mrb[23].mxu1  ;;  %2090 = vmatprep.mubr.bf16.mxu0 %v1327_v0  ;;  %vm1285_vm7 = vcmp.gt.f32.partialorder %v1241_v62, 0.0 }
 0x3b5   : > { %v1299_v6 = vmul.f32 0.2, %v1233_v1  ;;  %v1236_v7 = vadd.f32 %v2651_v44, %v1235_v5  ;;  %2091 = vmatmul.mubr.bf16.vlgmr.msra.gmra.mrb[32].mxu0 %v1328_v58  ;;  %vm1283_vm8 = vcmp.gt.f32.partialorder %v1233_v1, 0.0 }
 0x3b6   : > { %vm1286_vm9 = vcmp.gt.f32.partialorder %v1244_v4, 0.0  ;;  %v1302_v8 = vmul.f32 0.2, %v1244_v4  ;;  %2107 = vmatpush3.bf16.msra.mxu0 %v2209_v37  ;;  %v1317_v10 = vsel %vm1285_vm7, %v1241_v62, %v1301_v3 }
 0x3b7   : > { %vm1284_vm10 = vcmp.gt.f32.partialorder %v1236_v7, 0.0  ;;  %v1300_v9 = vmul.f32 0.2, %v1236_v7  ;;  %2108 = vmatprep.subr.bf16.mxu0 %v2616_v39  ;;  %v1315_v13 = vsel %vm1283_vm8, %v1233_v1, %v1299_v6 }
 0x3b8   : > { %v1318_v11 = vsel %vm1286_vm9, %v1244_v4, %v1302_v8 }
 0x3b9   : > { %v2068_v12 = vpop.f32.mrb[24].mxu1  ;;  %v1316_v14 = vsel %vm1284_vm10, %v1236_v7, %v1300_v9  ;;  %v1330_v15 = vpack.c.bf16 %v1318_v11, %v1317_v10 }
 0x3ba   : > { %v1257_v16 = vadd.f32 %v2068_v12, %v2651_v44  ;;  %v1248_v17 = vpop.f32.mrb[25].mxu1  ;;  %v1329_v18 = vpack.c.bf16 %v1316_v14, %v1315_v13  ;;  %2109 = vmatpush3.bf16.msra.mxu0 %v2616_v39 }
 0x3bb   : > { %v1249_v19 = vadd.f32 %v2651_v44, %v1248_v17  ;;  %v2069_v20 = vpop.f32.mrb[26].mxu1  ;;  %2110 = vmatprep.subr.bf16.mxu0 %v2622_v40 }
 0x3bc   : > { %v1305_v21 = vmul.f32 0.2, %v1257_v16  ;;  %v1260_v22 = vadd.f32 %v2069_v20, %v2651_v44  ;;  %v1251_v23 = vpop.f32.mrb[27].mxu1  ;;  %2094 = vmatprep.mubr.bf16.mxu0 %v1329_v18  ;;  %vm1289_vm11 = vcmp.gt.f32.partialorder %v1257_v16, 0.0 }
 0x3bd   : > { %v1303_v24 = vmul.f32 0.2, %v1249_v19  ;;  %v1252_v25 = vadd.f32 %v2651_v44, %v1251_v23  ;;  %2095 = vmatmul.mubr.bf16.gmra.mrb[36].mxu0 %v1330_v15  ;;  %vm1287_vm12 = vcmp.gt.f32.partialorder %v1249_v19, 0.0 }
 0x3be   : > { %vm1290_vm13 = vcmp.gt.f32.partialorder %v1260_v22, 0.0  ;;  %v1306_v26 = vmul.f32 0.2, %v1260_v22  ;;  %2111 = vmatpush3.bf16.msra.mxu0 %v2622_v40  ;;  %v1321_v28 = vsel %vm1289_vm11, %v1257_v16, %v1305_v21 }
 0x3bf   : > { %vm1288_vm14 = vcmp.gt.f32.partialorder %v1252_v25, 0.0  ;;  %v1304_v27 = vmul.f32 0.2, %v1252_v25  ;;  %2112 = vmatprep.subr.bf16.mxu0 %v2629_v41  ;;  %v1319_v31 = vsel %vm1287_vm12, %v1249_v19, %v1303_v24 }
 0x3c0   : > { %v1322_v29 = vsel %vm1290_vm13, %v1260_v22, %v1306_v26 }
 0x3c1   : > { %v2072_v30 = vpop.f32.mrb[28].mxu1  ;;  %v1320_v32 = vsel %vm1288_vm14, %v1252_v25, %v1304_v27  ;;  %v1332_v33 = vpack.c.bf16 %v1322_v29, %v1321_v28 }
 0x3c2   : > { %v1273_v34 = vadd.f32 %v2072_v30, %v2651_v44  ;;  %v1264_v35 = vpop.f32.mrb[29].mxu1  ;;  %v1331_v36 = vpack.c.bf16 %v1320_v32, %v1319_v31  ;;  %2113 = vmatpush3.bf16.msra.mxu0 %v2629_v41  ;;  %v1857_v31 = vld [vmem:[%s2744_s12] ss:$0 sm:$0xff] }
 0x3c3   : > { %v1265_v37 = vadd.f32 %v2651_v44, %v1264_v35  ;;  %v2073_v39 = vpop.f32.mrb[30].mxu1  ;;  %2114 = vmatprep.subr.bf16.mxu0 %v2636_v42 }
 0x3c4   : > { %v1309_v40 = vmul.f32 0.2, %v1273_v34  ;;  %v1276_v45 = vadd.f32 %v2073_v39, %v2651_v44  ;;  %v1267_v46 = vpop.f32.mrb[31].mxu1  ;;  %2098 = vmatprep.mubr.bf16.mxu0 %v1331_v36  ;;  %vm1293_vm15 = vcmp.gt.f32.partialorder %v1273_v34, 0.0 }
 0x3c5   : > { %v1307_v47 = vmul.f32 0.2, %v1265_v37  ;;  %v1268_v48 = vadd.f32 %v2651_v44, %v1267_v46  ;;  %2099 = vmatmul.mubr.bf16.gmra.mrb[40].mxu0 %v1332_v33  ;;  %vm1291_vm1 = vcmp.gt.f32.partialorder %v1265_v37, 0.0  ;;  %v2215_v44 = vld [vmem:[%s2743_s11 + $0x30] sm:$0xff]  }
 0x3c6   : > { %vm1294_vm2 = vcmp.gt.f32.partialorder %v1276_v45, 0.0  ;;  %v1310_v38 = vmul.f32 0.2, %v1276_v45  ;;  %2115 = vmatpush3.bf16.msra.mxu0 %v2636_v42  ;;  %v1325_v49 = vsel %vm1293_vm15, %v1273_v34, %v1309_v40  ;;  %2144 = vmatprep.subr.bf16.mxu1 %v2215_v44  ;;  %v2216_v42 = vld [vmem:[%s2743_s11 + $0x38] sm:$0xff]  }
 0x3c7   : > { %vm1292_vm3 = vcmp.gt.f32.partialorder %v1268_v48, 0.0  ;;  %v1308_v41 = vmul.f32 0.2, %v1268_v48  ;;  %2116 = vmatprep.subr.bf16.mxu0 %v2643_v43  ;;  %v1323_v51 = vsel %vm1291_vm1, %v1265_v37, %v1307_v47  ;;  %2152 = vmatpush3.bf16.msra.mxu1 %v2215_v44 }
 0x3c8   : > { %v1326_v50 = vsel %vm1294_vm2, %v1276_v45, %v1310_v38  ;;  %2145 = vmatprep.subr.bf16.mxu1 %v2216_v42 }
 0x3c9   : > { %v1324_v52 = vsel %vm1292_vm3, %v1268_v48, %v1308_v41  ;;  %v1334_v53 = vpack.c.bf16 %v1326_v50, %v1325_v49 }
 0x3ca   : > { %v1333_v54 = vpack.c.bf16 %v1324_v52, %v1323_v51  ;;  %2117 = vmatpush3.bf16.msra.mxu0 %v2643_v43  ;;  %v1848_v43 = vld [vmem:[%s2742_s10] ss:$0 sm:$0xff] }
 0x3cb   : > { %2118 = vmatprep.subr.bf16.mxu0 %v2215_v44  ;;  %2153 = vmatpush3.bf16.msra.mxu1 %v2216_v42 }
 0x3cc   : > { %2102 = vmatprep.mubr.bf16.mxu0 %v1333_v54 }
 0x3cd   : > { %2103 = vmatmul.mubr.bf16.gmra.mrb[44].mxu0 %v1334_v53 }
 0x3ce   : > { %2119 = vmatpush3.bf16.msra.mxu0 %v2215_v44 }
 0x3cf   : > { %2120 = vmatprep.subr.bf16.mxu0 %v2216_v42 }
 0x3d2   : > { %2121 = vmatpush3.bf16.msra.mxu0 %v2216_v42 }
 0x488   : > { %v2092_v55 = vpop.f32.mrb[32].mxu0 }
 0x489   : > { %v1440_v56 = vpop.f32.mrb[33].mxu0  ;;  %v1449_v58 = vadd.f32 %v2092_v55, %v1848_v43 }
 0x48a   : > { %v2093_v57 = vpop.f32.mrb[34].mxu0  ;;  %v1441_v61 = vadd.f32 %v1848_v43, %v1440_v56 }
 0x48b   : > { %v1452_v59 = vadd.f32 %v2093_v57, %v1848_v43  ;;  %v1443_v60 = vpop.f32.mrb[35].mxu0 }
 0x48c   : > { %v1444_v62 = vadd.f32 %v1848_v43, %v1443_v60 }
 0x48d   : > { %v1504_v63 = vpack.c.bf16 %v1452_v59, %v1449_v58 }
 0x48e   : > { %v1503_v0 = vpack.c.bf16 %v1444_v62, %v1441_v61 }
 0x490   : > { %v2096_v1 = vpop.f32.mrb[36].mxu0  ;;  %2122 = vmatprep.mubr.bf16.mxu0 %v1503_v0 }
 0x491   : > { %v1456_v2 = vpop.f32.mrb[37].mxu0  ;;  %2123 = vmatmul.mubr.bf16.vlgmr.msra.gmra.mrb[48].mxu0 %v1504_v63  ;;  %v1465_v4 = vadd.f32 %v2096_v1, %v1848_v43 }
 0x492   : > { %v2097_v3 = vpop.f32.mrb[38].mxu0  ;;  %v1457_v7 = vadd.f32 %v1848_v43, %v1456_v2 }
 0x493   : > { %v1468_v5 = vadd.f32 %v2097_v3, %v1848_v43  ;;  %v1459_v6 = vpop.f32.mrb[39].mxu0 }
 0x494   : > { %v1460_v8 = vadd.f32 %v1848_v43, %v1459_v6 }
 0x495   : > { %v1506_v9 = vpack.c.bf16 %v1468_v5, %v1465_v4 }
 0x496   : > { %v1505_v10 = vpack.c.bf16 %v1460_v8, %v1457_v7 }
 0x498   : > { %v2100_v11 = vpop.f32.mrb[40].mxu0  ;;  %2126 = vmatprep.mubr.bf16.mxu1 %v1505_v10 }
 0x499   : > { %v1472_v12 = vpop.f32.mrb[41].mxu0  ;;  %2127 = vmatmul.mubr.bf16.vlgmr.msra.gmra.mrb[32].mxu1 %v1506_v9  ;;  %v1481_v14 = vadd.f32 %v2100_v11, %v1848_v43 }
 0x49a   : > { %v2101_v13 = vpop.f32.mrb[42].mxu0  ;;  %v1473_v17 = vadd.f32 %v1848_v43, %v1472_v12 }
 0x49b   : > { %v1484_v15 = vadd.f32 %v2101_v13, %v1848_v43  ;;  %v1475_v16 = vpop.f32.mrb[43].mxu0 }
 0x49c   : > { %v1476_v18 = vadd.f32 %v1848_v43, %v1475_v16 }
 0x49d   : > { %v1508_v19 = vpack.c.bf16 %v1484_v15, %v1481_v14 }
 0x49e   : > { %v1507_v20 = vpack.c.bf16 %v1476_v18, %v1473_v17 }
 0x4a0   : > { %v2104_v21 = vpop.f32.mrb[44].mxu0  ;;  %2130 = vmatprep.mubr.bf16.mxu1 %v1507_v20 }
 0x4a1   : > { %v1488_v22 = vpop.f32.mrb[45].mxu0  ;;  %2131 = vmatmul.mubr.bf16.gmra.mrb[36].mxu1 %v1508_v19  ;;  %v1497_v24 = vadd.f32 %v2104_v21, %v1848_v43 }
 0x4a2   : > { %v2105_v23 = vpop.f32.mrb[46].mxu0  ;;  %v1489_v27 = vadd.f32 %v1848_v43, %v1488_v22 }
 0x4a3   : > { %v1500_v25 = vadd.f32 %v2105_v23, %v1848_v43  ;;  %v1491_v26 = vpop.f32.mrb[47].mxu0 }
 0x4a4   : > { %v1492_v28 = vadd.f32 %v1848_v43, %v1491_v26 }
 0x4a5   : > { %v1510_v29 = vpack.c.bf16 %v1500_v25, %v1497_v24 }
 0x4a6   : > { %v1509_v30 = vpack.c.bf16 %v1492_v28, %v1489_v27 }
 0x4a8   : > { %2134 = vmatprep.mubr.bf16.mxu1 %v1509_v30 }
 0x4a9   : > { %2135 = vmatmul.mubr.bf16.gmra.mrb[40].mxu1 %v1510_v29 }
 0x564   : > { %v2124_v32 = vpop.f32.mrb[48].mxu0 }
 0x565   : > { %v1625_v33 = vadd.f32 %v2124_v32, %v1857_v31  ;;  %v1616_v34 = vpop.f32.mrb[49].mxu0 }
 0x566   : > { %v1617_v35 = vadd.f32 %v1857_v31, %v1616_v34  ;;  %v2125_v36 = vpop.f32.mrb[50].mxu0 }
 0x567   : > { %1681 = vst.msk [vmem:[%s2695_s30 + $0x10] sm:$0xff] %vm548_vm0, %v1625_v33  ;;  %v1628_v37 = vadd.f32 %v2125_v36, %v1857_v31  ;;  %v1619_v39 = vpop.f32.mrb[51].mxu0 }
 0x568   : > { %1679 = vst.msk [vmem:[%s2695_s30] sm:$0xff] %vm548_vm0, %v1617_v35  ;;  %v1620_v40 = vadd.f32 %v1857_v31, %v1619_v39 }
 0x569   : > { %1682 = vst.msk [vmem:[%s2695_s30 + $0x18] sm:$0xff] %vm548_vm0, %v1628_v37 }
 0x56a   : > { %1680 = vst.msk [vmem:[%s2695_s30 + $0x8] sm:$0xff] %vm548_vm0, %v1620_v40 }
 0x56c   : > { %v2128_v45 = vpop.f32.mrb[32].mxu1 }
 0x56d   : > { %v1641_v46 = vadd.f32 %v2128_v45, %v1857_v31  ;;  %v1632_v47 = vpop.f32.mrb[33].mxu1 }
 0x56e   : > { %v1633_v48 = vadd.f32 %v1857_v31, %v1632_v47  ;;  %v2129_v38 = vpop.f32.mrb[34].mxu1 }
 0x56f   : > { %1685 = vst.msk [vmem:[%s2695_s30 + $0x30] sm:$0xff] %vm548_vm0, %v1641_v46  ;;  %v1644_v41 = vadd.f32 %v2129_v38, %v1857_v31  ;;  %v1635_v49 = vpop.f32.mrb[35].mxu1 }
 0x570   : > { %1683 = vst.msk [vmem:[%s2695_s30 + $0x20] sm:$0xff] %vm548_vm0, %v1633_v48  ;;  %v1636_v50 = vadd.f32 %v1857_v31, %v1635_v49 }
 0x571   : > { %1686 = vst.msk [vmem:[%s2695_s30 + $0x38] sm:$0xff] %vm548_vm0, %v1644_v41 }
 0x572   : > { %1684 = vst.msk [vmem:[%s2695_s30 + $0x28] sm:$0xff] %vm548_vm0, %v1636_v50 }
 0x574   : > { %v2132_v51 = vpop.f32.mrb[36].mxu1 }
 0x575   : > { %v1657_v52 = vadd.f32 %v2132_v51, %v1857_v31  ;;  %v1648_v53 = vpop.f32.mrb[37].mxu1 }
 0x576   : > { %v1649_v54 = vadd.f32 %v1857_v31, %v1648_v53  ;;  %v2133_v44 = vpop.f32.mrb[38].mxu1 }
 0x577   : > { %1689 = vst.msk [vmem:[%s2695_s30 + $0x50] sm:$0xff] %vm548_vm0, %v1657_v52  ;;  %v1660_v42 = vadd.f32 %v2133_v44, %v1857_v31  ;;  %v1651_v55 = vpop.f32.mrb[39].mxu1 }
 0x578   : > { %1687 = vst.msk [vmem:[%s2695_s30 + $0x40] sm:$0xff] %vm548_vm0, %v1649_v54  ;;  %v1652_v43 = vadd.f32 %v1857_v31, %v1651_v55 }
 0x579   : > { %1690 = vst.msk [vmem:[%s2695_s30 + $0x58] sm:$0xff] %vm548_vm0, %v1660_v42 }
 0x57a   : > { %1688 = vst.msk [vmem:[%s2695_s30 + $0x48] sm:$0xff] %vm548_vm0, %v1652_v43 }
 0x57c   : > { %v2136_v56 = vpop.f32.mrb[40].mxu1 }
 0x57d   : > { %v1673_v57 = vadd.f32 %v2136_v56, %v1857_v31  ;;  %v1664_v58 = vpop.f32.mrb[41].mxu1 }
 0x57e   : > { %v1665_v59 = vadd.f32 %v1857_v31, %v1664_v58  ;;  %v2137_v60 = vpop.f32.mrb[42].mxu1 }
 0x57f   : > { %1693 = vst.msk [vmem:[%s2695_s30 + $0x70] sm:$0xff] %vm548_vm0, %v1673_v57  ;;  %v1676_v61 = vadd.f32 %v2137_v60, %v1857_v31  ;;  %v1667_v62 = vpop.f32.mrb[43].mxu1 }
 0x580   : > { %1691 = vst.msk [vmem:[%s2695_s30 + $0x60] sm:$0xff] %vm548_vm0, %v1665_v59  ;;  %v1668_v63 = vadd.f32 %v1857_v31, %v1667_v62 }
 0x581   : > { %1694 = vst.msk [vmem:[%s2695_s30 + $0x78] sm:$0xff] %vm548_vm0, %v1676_v61 }
 0x582   : > { %1692 = vst.msk [vmem:[%s2695_s30 + $0x68] sm:$0xff] %vm548_vm0, %v1668_v63 }
 0x583 PF: > { %s26_s29 = sadd.s32 1, %s2287_s29  }
 0x584   : > { %p23_p3 = scmp.ge.s32.totalorder %s26_s29, 4  }
 0x586   :  { %25 = sbr.rel (!%p23_p3) target bundleno = 1 (0x1), region = 119 }
 0x58d   :  { %1734 = vsyncpa [#allocation3], 1 }
 0x58e   :  { %1736 = vsyncpa [#allocation3 + $0x1], 1 }

</bundles_post_ra>
